<compile_context>
chip_gen: v7x
topology: tpu7x:2x2x1
jax: 0.10.0
libtpu: 0.0.40
codegen_flags: <defaults>
</compile_context>

<pallas_src>
import jax
import jax.numpy as jnp
from jax.experimental import pallas as pl
from jax.experimental.pallas import tpu as pltpu


def attend_key_kernel(nf_ref, q_ref, stack_ref, ptr_ref, e_attn_ref, e_ptr_ref,
                      out_ref):
    # nf_ref:     (Bb, N, D)   node features
    # q_ref:      (Bb, 1, D)   query as a row (broadcasts against nf)
    # stack_ref:  (Bb, N*L)    att_stack, lane-dense
    # ptr_ref:    (Bb, L)      already-shifted stack pointer
    # e_attn_ref: (N,  N*L)    0/1 expansion: column n*L+l copies row n
    # e_ptr_ref:  (L,  N*L)    0/1 expansion: column n*L+l copies row l
    # out_ref:    (Bb, N*L)

    # logits[b, n] = sum_d nf[b, n, d] * q[b, d]
    # VPU multiply + XLU lane-reduce; sigmoid on the EUP (no width-1 MXU op).
    logits = jnp.sum(nf_ref[...] * q_ref[...], axis=-1)            # (Bb, N)
    attn = jax.nn.sigmoid(logits)                                  # (Bb, N)

    # Expand attn / ptr to lane-dense (Bb, N*L) slabs with small constant
    # matmuls whose outputs are 128 lanes wide.
    attn_slab = jnp.dot(attn, e_attn_ref[...],
                        preferred_element_type=jnp.float32)        # (Bb, N*L)
    ptr_slab = jnp.dot(ptr_ref[...], e_ptr_ref[...],
                       preferred_element_type=jnp.float32)         # (Bb, N*L)

    # write_to_stack: out = attn*ptr + stack*(1-ptr) = stack + ptr*(attn-stack)
    stack = stack_ref[...].astype(jnp.float32)
    out = stack + ptr_slab * (attn_slab - stack)
    out_ref[...] = out.astype(out_ref.dtype)


def _expansion_matrices(N, L, dtype):
    cols = jnp.arange(N * L)
    e_attn = (cols[None, :] // L == jnp.arange(N)[:, None]).astype(dtype)  # (N, N*L)
    e_ptr = (cols[None, :] % L == jnp.arange(L)[:, None]).astype(dtype)    # (L, N*L)
    return e_attn, e_ptr


def _pick_batch_block(B, N, D, L, bytes_per_elem=4, budget_bytes=8 << 20):
    """Largest batch block whose double-buffered working set fits in ~budget."""
    per_batch = bytes_per_elem * (N * D + D + 2 * N * L + L)
    cap = max(1, budget_bytes // (2 * per_batch))
    if B <= cap:
        return B
    # Prefer a sublane-aligned (multiple of 8) divisor of B.
    bb = (cap // 8) * 8
    while bb >= 8:
        if B % bb == 0:
            return bb
        bb -= 8
    bb = cap
    while bb > 1:
        if B % bb == 0:
            return bb
        bb -= 1
    return 1


def attend_key(node_feat, query, edge_matrices, att_stack, stack_ptr):
    """Pallas implementation of AttendKey.forward.

    edge_matrices is accepted for signature parity but unused (matches the
    PyTorch module's forward)."""
    del edge_matrices
    B, N, D = node_feat.shape
    L = stack_ptr.shape[1]

    # _move_ptr_fw hoisted to the wrapper: new_ptr[i] = ptr[i-1] (zero at i=0),
    # plus new_ptr[L-1] += ptr[L-1].  A trivial (B, L) op; keeping it here
    # removes an LxL matmul, one input and a tiny masked output from the kernel.
    shifted = jnp.concatenate(
        [jnp.zeros((B, 1), stack_ptr.dtype), stack_ptr[:, :-1]], axis=1)
    new_ptr = shifted.at[:, L - 1].add(stack_ptr[:, L - 1])        # (B, L)

    q_row = query.reshape(B, 1, D)            # broadcast row, no in-kernel transpose
    stack_flat = att_stack.reshape(B, N * L)  # lane-dense slab (layout plumbing)
    e_attn, e_ptr = _expansion_matrices(N, L, node_feat.dtype)

    Bb = _pick_batch_block(B, N, D, L)
    grid = (B // Bb,)

    out_flat = pl.pallas_call(
        attend_key_kernel,
        out_shape=jax.ShapeDtypeStruct((B, N * L), att_stack.dtype),
        grid=grid,
        in_specs=[
            pl.BlockSpec((Bb, N, D), lambda i: (i, 0, 0)),    # node_feat
            pl.BlockSpec((Bb, 1, D), lambda i: (i, 0, 0)),    # query row
            pl.BlockSpec((Bb, N * L), lambda i: (i, 0)),      # att_stack (flat)
            pl.BlockSpec((Bb, L), lambda i: (i, 0)),          # shifted pointer
            pl.BlockSpec((N, N * L), lambda i: (0, 0)),       # attn expansion (shared)
            pl.BlockSpec((L, N * L), lambda i: (0, 0)),       # ptr expansion (shared)
        ],
        out_specs=pl.BlockSpec((Bb, N * L), lambda i: (i, 0)),
        compiler_params=pltpu.CompilerParams(
            dimension_semantics=("parallel",)),
    )(node_feat, q_row, stack_flat, new_ptr, e_attn, e_ptr)

    return out_flat.reshape(B, N, L), new_ptr


def attend_key_ref(node_feat, query, edge_matrices, att_stack, stack_ptr):
    """Pure-JAX reference mirroring the PyTorch semantics."""
    del edge_matrices
    B, N, D = node_feat.shape
    L = stack_ptr.shape[1]
    logits = jnp.matmul(node_feat, query[..., None])          # (B, N, 1)
    attn = jax.nn.sigmoid(logits)
    shifted = jnp.concatenate(
        [jnp.zeros((B, 1), stack_ptr.dtype), stack_ptr[:, :-1]], axis=1)
    top_mask = jnp.zeros((L,), stack_ptr.dtype).at[L - 1].set(1.0)
    new_ptr = shifted + top_mask * stack_ptr                   # (B, L)
    ptr_expand = new_ptr[:, None, :]                           # (B, 1, L)
    new_stack = attn * ptr_expand + att_stack * (1.0 - ptr_expand)
    return new_stack, new_ptr


if __name__ == "__main__":
    B, N, D, L = 2, 16, 32, 8
    key = jax.random.PRNGKey(0)
    k1, k2, k3, k4 = jax.random.split(key, 4)

    node_feat = jax.random.normal(k1, (B, N, D), jnp.float32)
    query = jax.random.normal(k2, (B, D), jnp.float32)
    edge_matrices = jax.random.normal(k3, (B, N, N), jnp.float32)  # unused by forward
    att_stack = jax.random.uniform(k4, (B, N, L), jnp.float32)
    # pointer starts at stack position 0 (one-hot), as in the NMN stack convention
    stack_ptr = jnp.zeros((B, L), jnp.float32).at[:, 0].set(1.0)

    att_stack_out, stack_ptr_out = attend_key(
        node_feat, query, edge_matrices, att_stack, stack_ptr)
    jax.block_until_ready((att_stack_out, stack_ptr_out))

    ref_stack, ref_ptr = attend_key_ref(
        node_feat, query, edge_matrices, att_stack, stack_ptr)
    assert jnp.allclose(att_stack_out, ref_stack, atol=1e-5, rtol=1e-5)
    assert jnp.allclose(stack_ptr_out, ref_ptr, atol=1e-5, rtol=1e-5)

    print("KERNEL_OK")
</pallas_src>

<mosaic_0001>
module attributes {stable_mosaic.version = 11 : i64} {
  func.func @attend_key_kernel(%arg0: i32, %arg1: memref<2x16x32xf32, #tpu.memory_space<vmem>>, %arg2: memref<2x1x32xf32, #tpu.memory_space<vmem>>, %arg3: memref<2x128xf32, #tpu.memory_space<vmem>>, %arg4: memref<2x8xf32, #tpu.memory_space<vmem>>, %arg5: memref<16x128xf32, #tpu.memory_space<vmem>>, %arg6: memref<8x128xf32, #tpu.memory_space<vmem>>, %arg7: memref<2x128xf32, #tpu.memory_space<vmem>>) attributes {dimension_semantics = [#tpu.dimension_semantics<parallel>], iteration_bounds = array<i64: 1>, scalar_prefetch = 0 : i64, scratch_operands = 0 : i64, tpu.core_type = #tpu.core_type<tc>, window_params = [{transform_indices = @transform_0, window_bounds = array<i64: 2, 16, 32>}, {transform_indices = @transform_1, window_bounds = array<i64: 2, 1, 32>}, {transform_indices = @transform_2, window_bounds = array<i64: 2, 128>}, {transform_indices = @transform_3, window_bounds = array<i64: 2, 8>}, {pipeline_mode = #tpu.pipeline_mode<synchronous>, transform_indices = @transform_4, window_bounds = array<i64: 16, 128>}, {pipeline_mode = #tpu.pipeline_mode<synchronous>, transform_indices = @transform_5, window_bounds = array<i64: 8, 128>}, {transform_indices = @transform_6, window_bounds = array<i64: 2, 128>}]} {
    %c0 = arith.constant 0 : index
    %c0_0 = arith.constant 0 : index
    %c0_1 = arith.constant 0 : index
    %0 = vector.load %arg1[%c0, %c0_0, %c0_1] : memref<2x16x32xf32, #tpu.memory_space<vmem>>, vector<2x16x32xf32>
    %c0_2 = arith.constant 0 : index
    %c0_3 = arith.constant 0 : index
    %c0_4 = arith.constant 0 : index
    %1 = vector.load %arg2[%c0_2, %c0_3, %c0_4] : memref<2x1x32xf32, #tpu.memory_space<vmem>>, vector<2x1x32xf32>
    %2 = vector.broadcast %1 : vector<2x1x32xf32> to vector<2x16x32xf32>
    %3 = arith.mulf %0, %2 : vector<2x16x32xf32>
    %cst = arith.constant dense<0.000000e+00> : vector<2x16xf32>
    %4 = vector.multi_reduction <add>, %3, %cst [2] : vector<2x16x32xf32> to vector<2x16xf32>
    %5 = arith.negf %4 : vector<2x16xf32>
    %6 = math.exp %5 : vector<2x16xf32>
    %cst_5 = arith.constant 1.000000e+00 : f32
    %7 = vector.broadcast %cst_5 : f32 to vector<2x16xf32>
    %8 = arith.addf %7, %6 : vector<2x16xf32>
    %9 = arith.divf %7, %8 : vector<2x16xf32>
    %c0_6 = arith.constant 0 : index
    %c0_7 = arith.constant 0 : index
    %10 = vector.load %arg5[%c0_6, %c0_7] : memref<16x128xf32, #tpu.memory_space<vmem>>, vector<16x128xf32>
    %cst_8 = arith.constant dense<0.000000e+00> : vector<2x128xf32>
    %11 = tpu.matmul %9, %10, %cst_8 {dimension_numbers = #tpu.dot_dimension_numbers<[1], [0], [0], [1], [0, 0, 1, 1], [], []>} : vector<2x16xf32>, vector<16x128xf32>, vector<2x128xf32> -> vector<2x128xf32>
    %c0_9 = arith.constant 0 : index
    %c0_10 = arith.constant 0 : index
    %12 = vector.load %arg4[%c0_9, %c0_10] : memref<2x8xf32, #tpu.memory_space<vmem>>, vector<2x8xf32>
    %c0_11 = arith.constant 0 : index
    %c0_12 = arith.constant 0 : index
    %13 = vector.load %arg6[%c0_11, %c0_12] : memref<8x128xf32, #tpu.memory_space<vmem>>, vector<8x128xf32>
    %cst_13 = arith.constant dense<0.000000e+00> : vector<2x128xf32>
    %14 = tpu.matmul %12, %13, %cst_13 {dimension_numbers = #tpu.dot_dimension_numbers<[1], [0], [0], [1], [0, 0, 1, 1], [], []>} : vector<2x8xf32>, vector<8x128xf32>, vector<2x128xf32> -> vector<2x128xf32>
    %c0_14 = arith.constant 0 : index
    %c0_15 = arith.constant 0 : index
    %15 = vector.load %arg3[%c0_14, %c0_15] : memref<2x128xf32, #tpu.memory_space<vmem>>, vector<2x128xf32>
    %16 = arith.subf %11, %15 : vector<2x128xf32>
    %17 = arith.mulf %14, %16 : vector<2x128xf32>
    %18 = arith.addf %15, %17 : vector<2x128xf32>
    %c0_16 = arith.constant 0 : index
    %c0_17 = arith.constant 0 : index
    %19 = vector.load %arg7[%c0_16, %c0_17] : memref<2x128xf32, #tpu.memory_space<vmem>>, vector<2x128xf32>
    tpu.vector_store %arg7[%c0_16, %c0_17], %18 {strides = array<i32>} : memref<2x128xf32, #tpu.memory_space<vmem>>, vector<2x128xf32>,
    return
  }
  func.func @transform_0(%arg0: i32) -> (i32, i32, i32) {
    %c0_i32 = arith.constant 0 : i32
    %c0_i32_0 = arith.constant 0 : i32
    %c0_i32_1 = arith.constant 0 : i32
    return %arg0, %c0_i32, %c0_i32_0 : i32, i32, i32
  }
  func.func @transform_1(%arg0: i32) -> (i32, i32, i32) {
    %c0_i32 = arith.constant 0 : i32
    %c0_i32_0 = arith.constant 0 : i32
    %c0_i32_1 = arith.constant 0 : i32
    return %arg0, %c0_i32, %c0_i32_0 : i32, i32, i32
  }
  func.func @transform_2(%arg0: i32) -> (i32, i32) {
    %c0_i32 = arith.constant 0 : i32
    %c0_i32_0 = arith.constant 0 : i32
    return %arg0, %c0_i32 : i32, i32
  }
  func.func @transform_3(%arg0: i32) -> (i32, i32) {
    %c0_i32 = arith.constant 0 : i32
    %c0_i32_0 = arith.constant 0 : i32
    return %arg0, %c0_i32 : i32, i32
  }
  func.func @transform_4(%arg0: i32) -> (i32, i32) {
    %c0_i32 = arith.constant 0 : i32
    %c0_i32_0 = arith.constant 0 : i32
    %c0_i32_1 = arith.constant 0 : i32
    return %c0_i32, %c0_i32_0 : i32, i32
  }
  func.func @transform_5(%arg0: i32) -> (i32, i32) {
    %c0_i32 = arith.constant 0 : i32
    %c0_i32_0 = arith.constant 0 : i32
    %c0_i32_1 = arith.constant 0 : i32
    return %c0_i32, %c0_i32_0 : i32, i32
  }
  func.func @transform_6(%arg0: i32) -> (i32, i32) {
    %c0_i32 = arith.constant 0 : i32
    %c0_i32_0 = arith.constant 0 : i32
    return %arg0, %c0_i32 : i32, i32
  }
}

</mosaic_0001>

<bundles_post_ra>
// kernel: tpu_custom_call.1
= control target key start
LH: loop header
LB: loop body
LE: loop exit
PB: predicated region body
PF: predicated region fallthrough
CT: control target
= control target key end

     0   :  { %11 = vsyncpa [#allocation3], 0  ;;  %s529_s0 = inlined_call_operand.hbm [shape: f32[2,16,32], index: 0, kind: input, shape index: {}]   ;;  %s530_s1 = inlined_call_operand.vmem [shape: f32[2,1,32], index: 1, kind: input, shape index: {}]   ;;  %s531_s2 = inlined_call_operand.vmem [shape: f32[2,128], index: 2, kind: input, shape index: {}]   ;;  %s532_s3 = inlined_call_operand.vmem [shape: f32[2,8], index: 3, kind: input, shape index: {}]   ;;  %s533_s4 = inlined_call_operand.hbm [shape: f32[16,128], index: 4, kind: input, shape index: {}]   ;;  %s534_s5 = inlined_call_operand.vmem [shape: f32[8,128], index: 5, kind: input, shape index: {}]   ;;  %s535_s6 = inlined_call_operand.hbm [shape: f32[2,128], index: 6, kind: output, shape index: {}]  }
   0x1   :  { %12 = vsyncpa [#allocation6], 0 }
   0x2   :  { %13 = vsyncpa [#allocation4], 0  ;;  %s435_s21 = smov [#allocation2]   ;;  %s363_s25 = scalar_lea.hbm %s529_s0, 512 }
   0x3   :  { %s19_s22 = sshll.u32 %s435_s21, 4  ;;  %p364_p0 = scmp.ne.s32.totalorder %s529_s0, %s363_s25  ;;  %s20_s22 = int_to_ptr.vmem [resolvable:$true] %s19_s22 }
   0x4   :  { %p367_p1 = scmp.lt.u32.totalorder %s363_s25, %s529_s0 }
   0x6   :  { %p369_p2 = pnand %p367_p1, %p364_p0 }
   0x8   :  { %372 = shalt.err (!%p369_p2)
}
   0x9   :  { %s373_s30 = scalar_lea.vmem %s20_s22, 512  ;;  %p378_p4 = scmp.lt.s32.totalorder %s20_s22, %s20_s22 }
   0xa   :  { %p374_p3 = scmp.ne.s32.totalorder %s20_s22, %s373_s30  ;;  %p379_p5 = scmp.lt.s32.totalorder %s373_s30, %s373_s30 }
   0xc   :  { %p380_p6 = por %p379_p5, %p378_p4 }
   0xe   :  { %p381_p7 = pnand %p380_p6, %p374_p3 }
  0x10   :  { %384 = shalt.err (!%p381_p7)
}
  0x11   :  { %s436_s7 = smov 128   ;;  %s437_s8 = smov 8  }
  0x12   :  { %25 = dma.hbm_to_vmem [thread:$0]  %s529_s0, 512, %s20_s22, [#allocation3], %s436_s7, %s436_s7, %s437_s8  }
  0x13   :  { %s438_s11 = smov [#allocation5]   ;;  %s385_s15 = scalar_lea.hbm %s533_s4, 256 }
  0x14   :  { %s37_s12 = sshll.u32 %s438_s11, 4  ;;  %p386_p8 = scmp.ne.s32.totalorder %s533_s4, %s385_s15  ;;  %s38_s12 = int_to_ptr.vmem [resolvable:$true] %s37_s12 }
  0x15   :  { %p389_p9 = scmp.lt.u32.totalorder %s385_s15, %s533_s4 }
  0x17   :  { %p391_p10 = pnand %p389_p9, %p386_p8 }
  0x19   :  { %394 = shalt.err (!%p391_p10)
}
  0x1a   :  { %s395_s20 = scalar_lea.vmem %s38_s12, 256  ;;  %p400_p12 = scmp.lt.s32.totalorder %s38_s12, %s38_s12 }
  0x1b   :  { %p396_p11 = scmp.ne.s32.totalorder %s38_s12, %s395_s20  ;;  %p401_p13 = scmp.lt.s32.totalorder %s395_s20, %s395_s20 }
  0x1d   :  { %p402_p0 = por %p401_p13, %p400_p12 }
  0x1f   :  { %p403_p1 = pnand %p402_p0, %p396_p11 }
  0x21   :  { %406 = shalt.err (!%p403_p1)
}
  0x22   :  { %43 = dma.hbm_to_vmem [thread:$0]  %s533_s4, 256, %s38_s12, [#allocation6], %s436_s7, %s436_s7, %s437_s8  }
  0x23   :  { %429 = dma.done.wait [#allocation3], 512  }
  0x24   :  { %430 = vsyncadd [#allocation3], 4294966784 }
  0x25   :  { %431 = dma.done.wait [#allocation6], 256  }
  0x26   :  { %432 = vsyncadd [#allocation6], 4294967040  ;;  %v54_v0 = vld [vmem:[#allocation2 + $0x10] sm:$0xff]  ;;  %v312_v1 = vld [vmem:[%s530_s1 + $0x1] ss:$0 sm:$0xff]  ;;  %vm74_vm0 = vcmask 261120   ;;  %v117_v34 = vlaneseq }
  0x27   :  { %v52_v2 = vld [vmem:[#allocation2] sm:$0xff]  ;;  %v72_v3 = vmul.f32 %v312_v1, %v54_v0  ;;  %v55_v5 = vld [vmem:[#allocation2 + $0x18] sm:$0xff]  ;;  %v53_v6 = vld [vmem:[#allocation2 + $0x8] sm:$0xff]  ;;  %v439_v16 = vmov 0.0|0.0   ;;  %vm440_vm1 = vmmov 0   ;;  %v441_v18 = vmov 0.0  }
  0x28   :  { %v311_v4 = vld [vmem:[%s530_s1] ss:$0 sm:$0xff]  ;;  %v73_v8 = vmul.f32 %v312_v1, %v55_v5  ;;  %v112_v15 = vld [vmem:[#allocation5 + $0x8] sm:$0xff]  ;;  %336 = vmatprep.subr.bf16.mxu0 %v439_v16  ;;  %328 = vmatprep.mubr.msk.f32.mxu0 %vm440_vm1, %v441_v18  ;;  %vm216_vm2 = vcmask 64512   ;;  %v118_v38 = vand.u32 127, %v117_v34  ;;  %v120_v39 = vshrl.u32 %v117_v34, 7 }
  0x29   :  { %v70_v7 = vmul.f32 %v311_v4, %v52_v2  ;;  %v71_v9 = vmul.f32 %v311_v4, %v53_v6  ;;  %v81_v10 = vsel %vm74_vm0, %v72_v3, 0.0  ;;  %v111_v14 = vld [vmem:[#allocation5] sm:$0xff]  ;;  %331 = vmatprep.subr.mxu1 %v441_v18  ;;  %333 = vmatprep.mubr.msk.f32.mxu1 %vm440_vm1, %v441_v18  ;;  %vm128_vm3 = vcmask 130112   ;;  %s442_s28 = smov [#allocation7]  }
  0x2a   :  { %82 = vadd.xlane.f32.xlu1 %v81_v10  ;;  %v84_v12 = vsel %vm74_vm0, %v73_v8, 0.0  ;;  %v337_v17 = vpack.c.bf16 %v112_v15, %v111_v14  ;;  %v215_v19 = vld [vmem:[%s534_s5] sm:$0xff]  ;;  %v123_v40 = vadd.s32 4294967288, %v118_v38  ;;  %v121_v41 = vsub.s32 %v118_v38, %v120_v39  ;;  %s301_s29 = sshll.u32 %s442_s28, 4  ;;  %s302_s29 = int_to_ptr.vmem [resolvable:$true] %s301_s29 }
  0x2b   :  { %v75_v11 = vsel %vm74_vm0, %v70_v7, 0.0  ;;  %v78_v13 = vsel %vm74_vm0, %v71_v9, 0.0  ;;  %332 = vmatpush3.msra.mxu1 %v215_v19  ;;  %v214_v20 = vld [vmem:[%s532_s3] sm:$0x3]  ;;  %vm139_vm4 = vcmask 1041409   ;;  %vm141_vm5 = vcmask 130048   ;;  %p412_p3 = scmp.lt.s32.totalorder %s302_s29, %s302_s29 }
  0x2c   :  { %76 = vadd.xlane.f32.xlu0 %v75_v11  ;;  %338 = vmatpush3.bf16.msra.mxu0 %v337_v17  ;;  %v126_v42 = vsub.s32 %v123_v40, %v120_v39  ;;  %v290_v56 = vld [vmem:[%s531_s2] sm:$0x3]  ;;  %s407_s30 = scalar_lea.vmem %s302_s29, 32 }
  0x2d   :  { %334 = vmatmul.mubr.msk.f32.vlgmr.msra.gmra.mrb[0].mxu1 %vm216_vm2, %v214_v20  ;;  %p408_p2 = scmp.ne.s32.totalorder %s302_s29, %s407_s30  ;;  %p413_p4 = scmp.lt.s32.totalorder %s407_s30, %s407_s30 }
  0x2e   :  { %85 = vadd.xlane.f32.xlu1 %v84_v12 }
  0x2f   :  { %p414_p5 = por %p413_p4, %p412_p3 }
  0x30   :  { %79 = vadd.xlane.f32.xlu0 %v78_v13 }
  0x31   :  { %p415_p6 = pnand %p414_p5, %p408_p2 }
  0xb7   :  { %v83_v21 = vpop.xlane.xlu1 %82 }
  0xb8   :  { %v315_v22 = vmul.f32 -1.442695, %v83_v21 }
  0xb9   :  { %v77_v23 = vpop.xlane.xlu0 %76 }
  0xba   :  { %v313_v24 = vmul.f32 -1.442695, %v77_v23  ;;  %347 = vpow2.f32 %v315_v22 }
  0xbb   :  { %v86_v25 = vpop.xlane.xlu1 %85 }
  0xbc   :  { %349 = vpow2.f32 %v313_v24  ;;  %v316_v26 = vmul.f32 -1.442695, %v86_v25 }
  0xbd   :  { %v80_v27 = vpop.xlane.xlu0 %79 }
  0xbe   :  { %v314_v28 = vmul.f32 -1.442695, %v80_v27  ;;  %351 = vpow2.f32 %v316_v26 }
  0xc0   :  { %353 = vpow2.f32 %v314_v28 }
  0xc4   :  { %v348_v29 = vpop.eup %347 }
  0xc5   :  { %v101_v31 = vadd.f32 1.0, %v348_v29 }
  0xc6   :  { %v350_v30 = vpop.eup %349 }
  0xc7   :  { %v99_v32 = vadd.f32 1.0, %v350_v30  ;;  %355 = vrcp.f32 %v101_v31 }
  0xc8   :  { %v352_v33 = vpop.eup %351 }
  0xc9   :  { %v102_v36 = vadd.f32 1.0, %v352_v33  ;;  %357 = vrcp.f32 %v99_v32 }
  0xca   :  { %v354_v35 = vpop.eup %353 }
  0xcb   :  { %v100_v37 = vadd.f32 1.0, %v354_v35  ;;  %359 = vrcp.f32 %v102_v36 }
  0xcd   :  { %361 = vrcp.f32 %v100_v37 }
  0xd1   :  { %v356_v43 = vpop.eup %355 }
  0xd2   :  { %v133_v47 = vrot.slane %v356_v43, %v121_v41 }
  0xd3   :  { %v358_v44 = vpop.eup %357 }
  0xd4   :  { %v122_v49 = vrot.slane %v358_v44, %v121_v41 }
  0xd5   :  { %v360_v45 = vpop.eup %359 }
  0xd6   :  { %v137_v48 = vrot.slane %v360_v45, %v126_v42 }
  0xd7   :  { %v362_v46 = vpop.eup %361 }
  0xd8   :  { %v127_v50 = vrot.slane %v362_v46, %v126_v42  ;;  %v138_v51 = vsel %vm128_vm3, %v137_v48, %v133_v47 }
  0xda   :  { %v129_v52 = vsel %vm128_vm3, %v127_v50, %v122_v49 }
  0xdb   :  { %v140_v53 = vsel %vm139_vm4, %v138_v51, %v129_v52 }
  0xdc   :  { %329 = vmatmul.mubr.msk.f32.vlgmr.msra.gmra.mrb[0].mxu0 %vm141_vm5, %v140_v53 }
 0x100   :  { %v286_v54 = vpop.f32.mrb[0].mxu1 }
 0x101   :  { %v335_v55 = vpop.f32.mrb[1].mxu1 }
 0x1af   :  { %v210_v57 = vpop.f32.mrb[0].mxu0 }
 0x1b0   :  { %v291_v58 = vsub.f32 %v210_v57, %v290_v56  ;;  %v330_v59 = vpop.f32.mrb[1].mxu0 }
 0x1b2   :  { %v292_v60 = vmul.f32 %v291_v58, %v286_v54 }
 0x1b4   :  { %v293_v61 = vadd.f32 %v292_v60, %v290_v56 }
 0x1b6   :  { %294 = vst [vmem:[#allocation7] sm:$0x3] %v293_v61 }
 0x1b7   :  { %418 = shalt.err (!%p415_p6)
}
 0x1b8   :  { %s419_s2 = scalar_lea.hbm %s535_s6, 32 }
 0x1b9   :  { %p420_p7 = scmp.ne.s32.totalorder %s535_s6, %s419_s2  ;;  %p423_p8 = scmp.lt.u32.totalorder %s419_s2, %s535_s6 }
 0x1bb   :  { %p425_p9 = pnand %p423_p8, %p420_p7 }
 0x1bd   :  { %428 = shalt.err (!%p425_p9)
}
 0x1be   :  { %304 = dma.vmem_to_hbm [thread:$0]  %s302_s29, 32, %s535_s6, [#allocation4]  }
 0x1bf   :  { %433 = dma.done.wait [#allocation4], 32  }
 0x1c0   :  { %434 = vsyncadd [#allocation4], 4294967264 }
 0x1c1   :  { %308 = vsyncpa [#allocation3], 1 }
 0x1c2   :  { %309 = vsyncpa [#allocation6], 1 }
 0x1c3   :  { %310 = vsyncpa [#allocation4], 1 }

</bundles_post_ra>
